<compile_context>
chip_gen: v7x
topology: tpu7x:2x2x1
jax: 0.10.0
libtpu: 0.0.40
codegen_flags: <defaults>
</compile_context>

<pallas_src>
import math

import jax
import jax.numpy as jnp
from jax.experimental import pallas as pl
from jax.experimental.pallas import tpu as pltpu

_COL_CANDIDATES = (4096, 2048, 1024, 512, 256, 128)
_BLOCK_BYTES_X_ONLY = 4 * 1024 * 1024       # scalar-t / row-wise-t paths (2 streams)
_BLOCK_BYTES_STREAM_T = 2 * 1024 * 1024     # per-element-t path (3 streams)
_MAX_TILE_ROWS_ROWWISE = 2048               # bounds the (tile_rows, 1) param buffers
_VMEM_LIMIT = 32 * 1024 * 1024


# ---------------------------------------------------------------------------
# Kernels
# ---------------------------------------------------------------------------
def _bgc_scalar_t_kernel(params_ref, x_ref, o_ref):
    # params_ref: SMEM f32[2] = [gamma, log_beta], precomputed from (a, b, t).
    gamma = params_ref[0]
    log_beta = params_ref[1]
    # beta * x**gamma == exp(gamma * log(x) + log_beta)
    o_ref[...] = jnp.clip(jnp.exp(gamma * jnp.log(x_ref[...]) + log_beta), 0.0, 1.0)


def _bgc_rowwise_t_kernel(x_ref, gamma_ref, log_beta_ref, o_ref):
    # gamma_ref / log_beta_ref: (tile_rows, 1) f32, broadcast across lanes.
    o_ref[...] = jnp.clip(
        jnp.exp(gamma_ref[...] * jnp.log(x_ref[...]) + log_beta_ref[...]), 0.0, 1.0)


def _bgc_tensor_t_kernel(params_ref, x_ref, t_ref, o_ref):
    # params_ref: SMEM f32[2] = [a, b]; t streamed per element.
    a = params_ref[0]
    b = params_ref[1]
    gamma = jnp.exp(-a * jnp.log(t_ref[...]))            # (1/t)**a, no divide
    # beta folded into the exponent: 4 transcendentals/elem instead of 5.
    o_ref[...] = jnp.clip(
        jnp.exp(gamma * jnp.log(x_ref[...]) + b * (1.0 - gamma)), 0.0, 1.0)


# ---------------------------------------------------------------------------
# Tiling helpers
# ---------------------------------------------------------------------------
def _round_up(n, m):
    return ((n + m - 1) // m) * m


def _choose_cols(total, quantum=None):
    """Largest lane width (128-multiple, <= 4096) dividing `total` (and `quantum`
    if given), preferring widths that leave >= 8 rows (sublane-dense).  Returns
    None if no candidate divides (ragged element count)."""
    best_any = None
    for c in _COL_CANDIDATES:            # descending
        if total % c != 0 or (quantum is not None and quantum % c != 0):
            continue
        if best_any is None:
            best_any = c
        if total // c >= 8:
            return c
    return best_any


def _plan_rows(rows, cols, max_block_bytes, max_tile_rows=1 << 30):
    """Pick (tile_rows, num_blocks).  tile_rows is a multiple of 8 (or == rows);
    blocks stay under max_block_bytes; >= 2 blocks whenever there is enough work
    so the 'parallel' grid axis can shard across both v7x TensorCores."""
    budget = max(8, ((max_block_bytes // 4) // cols) // 8 * 8)
    budget = min(budget, max_tile_rows)
    if rows <= budget:
        if rows >= 16:
            tile_rows = _round_up(-(-rows // 2), 8)      # >= 2 blocks (megacore)
        else:
            tile_rows = rows                             # one tiny block
    else:
        tile_rows = budget
    return tile_rows, -(-rows // tile_rows)


def _as_slab(arr, rows, cols, total):
    """View `arr` as a (rows, cols) slab; copies only in the rare ragged case."""
    flat = arr.reshape(-1)
    padded = rows * cols
    if padded != total:
        # Pad with 1.0 so log() on the tail stays finite (tail is discarded).
        flat = jnp.concatenate([flat, jnp.ones((padded - total,), flat.dtype)])
    return flat.reshape(rows, cols)


def _from_slab(out2, out_shape, total):
    if out2.size != total:                               # ragged: strip the pad
        return out2.reshape(-1)[:total].reshape(out_shape)
    return out2.reshape(out_shape)                       # free reshape


# ---------------------------------------------------------------------------
# Wrapper
# ---------------------------------------------------------------------------
def beta_gamma_correction(x, t, a_param, b_param):
    """Pallas TPU forward of BetaGammaCorrection.

    x: any float shape.  t: positive scalar or array broadcastable with x.
    a_param, b_param: shape-(1,) parameters, matching the nn.Module."""
    x = jnp.asarray(x, jnp.float32)
    t_arr = jnp.asarray(t, jnp.float32)
    a = jnp.asarray(a_param, jnp.float32).reshape(())
    b = jnp.asarray(b_param, jnp.float32).reshape(())

    out_shape = jnp.broadcast_shapes(x.shape, t_arr.shape)
    if x.shape != out_shape:
        x = jnp.broadcast_to(x, out_shape)
    total = int(math.prod(out_shape))
    if total == 0:
        return jnp.zeros(out_shape, jnp.float32)

    smem_spec = pl.BlockSpec(memory_space=pltpu.MemorySpace.SMEM)
    cparams = pltpu.CompilerParams(dimension_semantics=("parallel",),
                                   vmem_limit_bytes=_VMEM_LIMIT)

    # ----- scalar-t fast path: all transcendentals of t hoisted to scalars. ---
    if t_arr.size == 1:
        gamma = jnp.exp(-a * jnp.log(t_arr.reshape(())))          # (1/t)**a
        params = jnp.stack([gamma, b * (1.0 - gamma)])            # [gamma, log_beta]

        cols = _choose_cols(total)
        if cols is None:
            cols = 128                                            # ragged (rare)
        rows = -(-total // cols)
        tile_rows, nb = _plan_rows(rows, cols, _BLOCK_BYTES_X_ONLY)
        x2 = _as_slab(x, rows, cols, total)
        out2 = pl.pallas_call(
            _bgc_scalar_t_kernel,
            out_shape=jax.ShapeDtypeStruct((rows, cols), jnp.float32),
            grid=(nb,),
            in_specs=[smem_spec,
                      pl.BlockSpec((tile_rows, cols), lambda i: (i, 0))],
            out_specs=pl.BlockSpec((tile_rows, cols), lambda i: (i, 0)),
            compiler_params=cparams,
        )(params, x2)
        return _from_slab(out2, out_shape, total)

    # ----- low-rank t (per-image / per-channel): t constant along slab rows. ---
    t_shape = (1,) * (len(out_shape) - t_arr.ndim) + t_arr.shape  # left-align
    last_vary = max(d for d, s in enumerate(t_shape) if s != 1)
    trailing = int(math.prod(out_shape[last_vary + 1:]))          # t constant over this
    cols = _choose_cols(total, quantum=trailing) if trailing >= 128 else None

    if cols is not None:
        rows = total // cols
        lead_shape = out_shape[:last_vary + 1]
        t_lead = jnp.broadcast_to(
            t_arr.reshape(t_shape[:last_vary + 1]), lead_shape).reshape(-1)
        gamma_lead = jnp.exp(-a * jnp.log(t_lead))                # small array
        log_beta_lead = b * (1.0 - gamma_lead)
        reps = trailing // cols                                   # rows per t value
        gamma_rows = jnp.repeat(gamma_lead, reps).reshape(rows, 1)
        log_beta_rows = jnp.repeat(log_beta_lead, reps).reshape(rows, 1)

        tile_rows, nb = _plan_rows(rows, cols, _BLOCK_BYTES_X_ONLY,
                                   max_tile_rows=_MAX_TILE_ROWS_ROWWISE)
        out2 = pl.pallas_call(
            _bgc_rowwise_t_kernel,
            out_shape=jax.ShapeDtypeStruct((rows, cols), jnp.float32),
            grid=(nb,),
            in_specs=[pl.BlockSpec((tile_rows, cols), lambda i: (i, 0)),
                      pl.BlockSpec((tile_rows, 1), lambda i: (i, 0)),
                      pl.BlockSpec((tile_rows, 1), lambda i: (i, 0))],
            out_specs=pl.BlockSpec((tile_rows, cols), lambda i: (i, 0)),
            compiler_params=cparams,
        )(x.reshape(rows, cols), gamma_rows, log_beta_rows)
        return out2.reshape(out_shape)

    # ----- general per-element t: stream t alongside x. -----------------------
    cols = _choose_cols(total)
    if cols is None:
        cols = 128                                                # ragged (rare)
    rows = -(-total // cols)
    tile_rows, nb = _plan_rows(rows, cols, _BLOCK_BYTES_STREAM_T)
    x2 = _as_slab(x, rows, cols, total)
    t2 = _as_slab(jnp.broadcast_to(t_arr, out_shape), rows, cols, total)
    params = jnp.stack([a, b])
    out2 = pl.pallas_call(
        _bgc_tensor_t_kernel,
        out_shape=jax.ShapeDtypeStruct((rows, cols), jnp.float32),
        grid=(nb,),
        in_specs=[smem_spec,
                  pl.BlockSpec((tile_rows, cols), lambda i: (i, 0)),
                  pl.BlockSpec((tile_rows, cols), lambda i: (i, 0))],
        out_specs=pl.BlockSpec((tile_rows, cols), lambda i: (i, 0)),
        compiler_params=cparams,
    )(params, x2, t2)
    return _from_slab(out2, out_shape, total)


# ---------------------------------------------------------------------------
# Demo / correctness check
# ---------------------------------------------------------------------------
def _reference(x, t, a, b):
    k = 1.0 / t
    gamma = jnp.power(k, a)
    beta = jnp.exp(b * (1.0 - gamma))
    return jnp.clip(beta * jnp.power(x, gamma), 0.0, 1.0)


if __name__ == "__main__":
    key = jax.random.PRNGKey(0)
    kx, kt1, kt2 = jax.random.split(key, 3)

    # Small NCHW input; values in (0, 1].
    x = jax.random.uniform(kx, (2, 4, 16, 16), dtype=jnp.float32,
                           minval=1e-3, maxval=1.0)

    # Parameters matching the nn.Module init.
    a_param = jnp.full((1,), -0.3293, jnp.float32)
    b_param = jnp.full((1,), 1.1258, jnp.float32)
    a_s, b_s = a_param.reshape(()), b_param.reshape(())

    # 1) Scalar t (fast path: only x streamed).
    t_scalar = jnp.float32(0.5)
    y1 = jax.block_until_ready(beta_gamma_correction(x, t_scalar, a_param, b_param))
    assert bool(jnp.allclose(y1, _reference(x, t_scalar, a_s, b_s),
                             atol=1e-4, rtol=1e-4)), "scalar-t path mismatch"

    # 2) Per-image t (low-rank path: per-row gamma/log_beta, only x streamed).
    t_img = jax.random.uniform(kt1, (2, 1, 1, 1), dtype=jnp.float32,
                               minval=0.1, maxval=2.0)
    y2 = jax.block_until_ready(beta_gamma_correction(x, t_img, a_param, b_param))
    assert bool(jnp.allclose(y2, _reference(x, t_img, a_s, b_s),
                             atol=1e-4, rtol=1e-4)), "low-rank-t path mismatch"

    # 3) Per-element t (streamed-t fallback).
    t_full = jax.random.uniform(kt2, (2, 4, 16, 16), dtype=jnp.float32,
                                minval=0.1, maxval=2.0)
    y3 = jax.block_until_ready(beta_gamma_correction(x, t_full, a_param, b_param))
    assert bool(jnp.allclose(y3, _reference(x, t_full, a_s, b_s),
                             atol=1e-4, rtol=1e-4)), "tensor-t path mismatch"

    # 4) Ragged element count (minimal pad fallback), scalar t.
    x_r = jax.random.uniform(kx, (3, 5, 7), dtype=jnp.float32,
                             minval=1e-3, maxval=1.0)
    y4 = jax.block_until_ready(beta_gamma_correction(x_r, t_scalar, a_param, b_param))
    assert bool(jnp.allclose(y4, _reference(x_r, t_scalar, a_s, b_s),
                             atol=1e-4, rtol=1e-4)), "ragged path mismatch"

    print("KERNEL_OK")
</pallas_src>

<mosaic_0001>
module attributes {stable_mosaic.version = 11 : i64} {
  func.func @_bgc_scalar_t_kernel(%arg0: i32, %arg1: memref<2xf32, #tpu.memory_space<smem>>, %arg2: memref<8x256xf32, #tpu.memory_space<vmem>>, %arg3: memref<8x256xf32, #tpu.memory_space<vmem>>) attributes {dimension_semantics = [#tpu.dimension_semantics<parallel>], iteration_bounds = array<i64: 1>, scalar_prefetch = 0 : i64, scratch_operands = 0 : i64, tpu.core_type = #tpu.core_type<tc>, window_params = [{transform_indices = @transform_0, window_bounds = array<i64: 2>}, {transform_indices = @transform_1, window_bounds = array<i64: 8, 256>}, {transform_indices = @transform_2, window_bounds = array<i64: 8, 256>}]} {
    %c0 = arith.constant 0 : index
    %0 = memref.load %arg1[%c0] : memref<2xf32, #tpu.memory_space<smem>>
    %c1 = arith.constant 1 : index
    %1 = memref.load %arg1[%c1] : memref<2xf32, #tpu.memory_space<smem>>
    %c0_0 = arith.constant 0 : index
    %c0_1 = arith.constant 0 : index
    %2 = vector.load %arg2[%c0_0, %c0_1] : memref<8x256xf32, #tpu.memory_space<vmem>>, vector<8x256xf32>
    %3 = math.log %2 : vector<8x256xf32>
    %4 = vector.broadcast %0 : f32 to vector<8x256xf32>
    %5 = arith.mulf %4, %3 : vector<8x256xf32>
    %6 = vector.broadcast %1 : f32 to vector<8x256xf32>
    %7 = arith.addf %5, %6 : vector<8x256xf32>
    %8 = math.exp %7 : vector<8x256xf32>
    %cst = arith.constant 0.000000e+00 : f32
    %cst_2 = arith.constant 1.000000e+00 : f32
    %9 = vector.broadcast %cst : f32 to vector<8x256xf32>
    %10 = arith.maximumf %9, %8 : vector<8x256xf32>
    %11 = vector.broadcast %cst_2 : f32 to vector<8x256xf32>
    %12 = arith.minimumf %11, %10 : vector<8x256xf32>
    %c0_3 = arith.constant 0 : index
    %c0_4 = arith.constant 0 : index
    %13 = vector.load %arg3[%c0_3, %c0_4] : memref<8x256xf32, #tpu.memory_space<vmem>>, vector<8x256xf32>
    tpu.vector_store %arg3[%c0_3, %c0_4], %12 {strides = array<i32>} : memref<8x256xf32, #tpu.memory_space<vmem>>, vector<8x256xf32>,
    return
  }
  func.func @transform_0(%arg0: i32) -> i32 {
    %c0_i32 = arith.constant 0 : i32
    %c0_i32_0 = arith.constant 0 : i32
    return %c0_i32 : i32
  }
  func.func @transform_1(%arg0: i32) -> (i32, i32) {
    %c0_i32 = arith.constant 0 : i32
    %c0_i32_0 = arith.constant 0 : i32
    return %arg0, %c0_i32 : i32, i32
  }
  func.func @transform_2(%arg0: i32) -> (i32, i32) {
    %c0_i32 = arith.constant 0 : i32
    %c0_i32_0 = arith.constant 0 : i32
    return %arg0, %c0_i32 : i32, i32
  }
}

</mosaic_0001>

<bundles_post_ra>
// kernel: tpu_custom_call.1
= control target key start
LH: loop header
LB: loop body
LE: loop exit
PB: predicated region body
PF: predicated region fallthrough
CT: control target
= control target key end

     0   :  { %7 = vsyncpa [#allocation5], 0  ;;  %s201_s0 = inlined_call_operand.hbm [shape: f32[2], index: 0, kind: input, shape index: {}]   ;;  %s202_s1 = inlined_call_operand.hbm [shape: f32[8,256], index: 1, kind: input, shape index: {}]   ;;  %s203_s2 = inlined_call_operand.hbm [shape: f32[8,256], index: 2, kind: output, shape index: {}]  }
   0x1   :  { %8 = vsyncpa [#allocation3], 0 }
   0x2   :  { %9 = vsyncpa [#allocation4], 0  ;;  %s87_s11 = scalar_lea.hbm %s201_s0, 16 }
   0x3   :  { %p88_p0 = scmp.ne.s32.totalorder %s201_s0, %s87_s11  ;;  %p91_p1 = scmp.lt.u32.totalorder %s87_s11, %s201_s0 }
   0x5   :  { %p93_p2 = pnand %p91_p1, %p88_p0 }
   0x7   :  { %96 = shalt.err (!%p93_p2)
}
   0x8   :  { %s147_s16 = smov [#allocation2]   ;;  %s148_s19 = smov [#allocation6]  }
   0x9   :  { %17 = dma.hbm_to_smem %s201_s0, 16, %s147_s16, [#allocation5]  }
   0xa   :  { %s24_s20 = sshll.u32 %s148_s19, 4  ;;  %s97_s23 = scalar_lea.hbm %s202_s1, 256  ;;  %s25_s20 = int_to_ptr.vmem [resolvable:$true] %s24_s20 }
   0xb   :  { %p98_p3 = scmp.ne.s32.totalorder %s202_s1, %s97_s23  ;;  %p101_p4 = scmp.lt.u32.totalorder %s97_s23, %s202_s1 }
   0xd   :  { %p103_p5 = pnand %p101_p4, %p98_p3 }
   0xf   :  { %106 = shalt.err (!%p103_p5)
}
  0x10   :  { %s107_s28 = scalar_lea.vmem %s25_s20, 256  ;;  %p112_p7 = scmp.lt.s32.totalorder %s25_s20, %s25_s20 }
  0x11   :  { %p108_p6 = scmp.ne.s32.totalorder %s25_s20, %s107_s28  ;;  %p113_p8 = scmp.lt.s32.totalorder %s107_s28, %s107_s28 }
  0x13   :  { %p114_p9 = por %p113_p8, %p112_p7 }
  0x15   :  { %p115_p10 = pnand %p114_p9, %p108_p6 }
  0x17   :  { %118 = shalt.err (!%p115_p10)
}
  0x18   :  { %27 = dma.hbm_to_vmem [thread:$0]  %s202_s1, 256, %s25_s20, [#allocation3]  }
  0x19   :  { %141 = dma.done.wait [#allocation5], 16  }
  0x1a   :  { %142 = vsyncadd [#allocation5], 4294967280 }
  0x1b   :  { %143 = dma.done.wait [#allocation3], 256  }
  0x1c   :  { %144 = vsyncadd [#allocation3], 4294967040 }
  0x1d   :  { %34 = sfence }
  0x1e   :  { %v37_v0 = vld [vmem:[#allocation6] sm:$0xff]  ;;  %v38_v1 = vld [vmem:[#allocation6 + $0x8] sm:$0xff]  ;;  %s35_s30 = sld [smem:[#allocation2]]  ;;  %s75_s3 = sld [smem:[#allocation2 + $0x1]] }
  0x1f   :  { %79 = vlog2.f32 %v37_v0  ;;  %s149_s1 = smov [#allocation7]  }
  0x20   :  { %81 = vlog2.f32 %v38_v1  ;;  %s65_s4 = sshll.u32 %s149_s1, 4  ;;  %s66_s4 = int_to_ptr.vmem [resolvable:$true] %s65_s4 }
  0x21   :  { %s119_s5 = scalar_lea.vmem %s66_s4, 256  ;;  %p124_p12 = scmp.lt.s32.totalorder %s66_s4, %s66_s4 }
  0x22   :  { %p120_p11 = scmp.ne.s32.totalorder %s66_s4, %s119_s5  ;;  %p125_p13 = scmp.lt.s32.totalorder %s119_s5, %s119_s5 }
  0x24   :  { %v43_v3 = vstv %s35_s30  ;;  %v46_v6 = vstv %s75_s3  ;;  %p126_p0 = por %p125_p13, %p124_p12 }
  0x26   :  { %p127_p1 = pnand %p126_p0, %p120_p11 }
  0x29   :  { %v80_v2 = vpop.eup %79 }
  0x2a   :  { %v82_v4 = vpop.eup %81  ;;  %v40_v5 = vmul.f32 0.6931472, %v80_v2 }
  0x2b   :  { %v42_v7 = vmul.f32 0.6931472, %v82_v4 }
  0x2c   :  { %v44_v8 = vmul.f32 %v43_v3, %v40_v5 }
  0x2d   :  { %v45_v9 = vmul.f32 %v43_v3, %v42_v7 }
  0x2e   :  { %v47_v10 = vadd.f32 %v46_v6, %v44_v8 }
  0x2f   :  { %v48_v11 = vadd.f32 %v46_v6, %v45_v9 }
  0x30   :  { %v49_v12 = vmul.f32 1.442695, %v47_v10 }
  0x31   :  { %v51_v13 = vmul.f32 1.442695, %v48_v11 }
  0x32   :  { %83 = vpow2.f32 %v49_v12 }
  0x33   :  { %85 = vpow2.f32 %v51_v13 }
  0x3c   :  { %v84_v14 = vpop.eup %83 }
  0x3d   :  { %v86_v15 = vpop.eup %85  ;;  %v53_v16 = vmax.f32 %v84_v14, 0.0 }
  0x3e   :  { %v54_v17 = vmax.f32 %v86_v15, 0.0 }
  0x3f   :  { %v55_v18 = vmin.f32 %v53_v16, 1.0 }
  0x40   :  { %v56_v19 = vmin.f32 %v54_v17, 1.0 }
  0x41   :  { %57 = vst [vmem:[#allocation7] sm:$0xff] %v55_v18 }
  0x42   :  { %58 = vst [vmem:[#allocation7 + $0x8] sm:$0xff] %v56_v19 }
  0x43   :  { %130 = shalt.err (!%p127_p1)
}
  0x44   :  { %s131_s8 = scalar_lea.hbm %s203_s2, 256 }
  0x45   :  { %p132_p2 = scmp.ne.s32.totalorder %s203_s2, %s131_s8  ;;  %p135_p3 = scmp.lt.u32.totalorder %s131_s8, %s203_s2 }
  0x47   :  { %p137_p4 = pnand %p135_p3, %p132_p2 }
  0x49   :  { %140 = shalt.err (!%p137_p4)
}
  0x4a   :  { %68 = dma.vmem_to_hbm [thread:$0]  %s66_s4, 256, %s203_s2, [#allocation4]  }
  0x4b   :  { %145 = dma.done.wait [#allocation4], 256  }
  0x4c   :  { %146 = vsyncadd [#allocation4], 4294967040 }
  0x4d   :  { %72 = vsyncpa [#allocation3], 1 }
  0x4e   :  { %73 = vsyncpa [#allocation4], 1 }
  0x4f   :  { %74 = vsyncpa [#allocation5], 1 }

</bundles_post_ra>
